<compile_context>
chip_gen: v7x
topology: tpu7x:2x2x1
jax: 0.10.0
libtpu: 0.0.40
codegen_flags: <defaults>
</compile_context>

<pallas_src>
import functools

import jax
import jax.numpy as jnp
from jax.experimental import pallas as pl
from jax.experimental.pallas import tpu as pltpu

NUM_HIDDEN_LAYERS = 2  # matches Net(num_hidden_layers=2)


def _sigmoid(z, eup_dtype=jnp.float32):
    # EUP-friendly sigmoid: one tanh on the (otherwise idle) EUP slot instead of an
    # exp + f32 divide on the VALU. Mathematically identical to 1/(1+exp(-z)) in f32;
    # with eup_dtype=bfloat16 the transcendental uses the bf16 EUP path (v6e/v7x).
    zz = z.astype(eup_dtype) if eup_dtype != z.dtype else z
    s = 0.5 * jnp.tanh(0.5 * zz) + 0.5
    return s.astype(z.dtype)


def net_kernel(x_ref, w1_ref, b1_ref, wh_ref, bh_ref, wl_ref, bl_ref, o_ref, *,
               num_hidden_layers, eup_dtype):
    """One batch tile of Net's forward pass (feature-major activations).

    x_ref : (TILE_B, num_input)  batch-major input tile, streamed straight from HBM
    w1    : (hidden, num_input)  PyTorch-native [out, in]
    b1,bh : (hidden, 1)
    wh    : (hidden, hidden)
    wl    : (hidden, 1)
    bl    : (1, 1)
    o_ref : (1, TILE_B)          lane-dense output row
    """
    # fc1: contract x's last dim against w1's last dim -> (hidden, TILE_B).
    # No materialized transpose of x anywhere (wrapper or kernel).
    z1 = jnp.einsum("hi,bi->hb", w1_ref[...], x_ref[...],
                    preferred_element_type=jnp.float32) + b1_ref[...]
    h = _sigmoid(z1, eup_dtype)

    # fc_hidden is ONE layer reused num_hidden_layers times (weight sharing), exactly
    # as in the PyTorch forward loop. Ref loads hoisted; the (hidden, 1) bias
    # lane-broadcasts for free inside the VPU add (no broadcast temp).
    wh = wh_ref[...]
    bh = bh_ref[...]
    for _ in range(num_hidden_layers):
        h = _sigmoid(jnp.dot(wh, h, preferred_element_type=jnp.float32) + bh,
                     eup_dtype)

    # Last layer (hidden -> 1): VPU broadcast-multiply + sublane reduce. An N=1 MXU
    # matmul would waste the systolic array and yield a lane-sparse column.
    logits = jnp.sum(h * wl_ref[...], axis=0, keepdims=True) + bl_ref[...]
    o_ref[...] = (_sigmoid(logits, eup_dtype) * 5.0).astype(o_ref.dtype)


def _round_up(n, m):
    return ((n + m - 1) // m) * m


def _choose_tile(batch, tile_b):
    """Pick the batch tile size.

    * small batches: one block whose dims equal the array dims (always a legal
      BlockSpec, zero padding).
    * large batches: 128-aligned tiles (lane-dense (1, tb) output stores) capped at
      `tile_b`, with at least 2 grid steps so the "parallel" batch axis can be
      sharded across both v7x TensorCores.
    """
    if batch < 256:
        return batch
    return min(_round_up(tile_b, 128), _round_up(pl.cdiv(batch, 2), 128))


def net_forward(x, params, *, tile_b=8192, eup_dtype=jnp.float32):
    """x: (batch, num_input) f32. Returns (batch, 1) f32, matching PyTorch Net.

    No wrapper-side transpose / pad: x is consumed exactly once, straight from HBM.
    (If x can already be produced in bf16 upstream, streaming it as bf16 halves the
    HBM cost on v5e; kept f32 here to match the f32 reference numerics.)
    """
    batch, num_input = x.shape
    hidden = params["w1"].shape[0]

    tb = _choose_tile(batch, tile_b)
    grid = (pl.cdiv(batch, tb),)  # ragged last tile -> partial-block DMA / masked store

    # Weights/biases: full block, constant index_map -> DMA'd once, stay in VMEM.
    resident = lambda shape: pl.BlockSpec(shape, lambda i: (0, 0))

    kernel = functools.partial(net_kernel,
                               num_hidden_layers=NUM_HIDDEN_LAYERS,
                               eup_dtype=eup_dtype)

    out = pl.pallas_call(
        kernel,
        out_shape=jax.ShapeDtypeStruct((1, batch), jnp.float32),
        grid=grid,
        in_specs=[
            pl.BlockSpec((tb, num_input), lambda i: (i, 0)),   # x tile (streamed)
            resident((hidden, num_input)),                     # w1
            resident((hidden, 1)),                             # b1
            resident((hidden, hidden)),                        # wh
            resident((hidden, 1)),                             # bh
            resident((hidden, 1)),                             # wl
            resident((1, 1)),                                  # bl
        ],
        out_specs=pl.BlockSpec((1, tb), lambda i: (0, i)),     # lane-dense output row
        compiler_params=pltpu.CompilerParams(
            dimension_semantics=("parallel",),  # batch tiles shard across TCs (v7x)
        ),
    )(
        x,
        params["w1"], params["b1"],
        params["wh"], params["bh"],
        params["wl"], params["bl"],
    )
    return out.reshape(batch, 1)


def init_params(key, num_input, hidden):
    """Mimics nn.Linear default init U(-1/sqrt(fan_in), 1/sqrt(fan_in)).

    fc1 / fc_hidden weights are stored in PyTorch's native [out, in] layout;
    fc_last's weight is stored as a (hidden, 1) column; biases as columns.
    """
    k1, k2, k3, k4, k5, k6 = jax.random.split(key, 6)

    def uni(k, shape, fan_in):
        bound = 1.0 / jnp.sqrt(jnp.float32(fan_in))
        return jax.random.uniform(k, shape, jnp.float32, -bound, bound)

    return {
        "w1": uni(k1, (hidden, num_input), num_input),
        "b1": uni(k2, (hidden, 1), num_input),
        "wh": uni(k3, (hidden, hidden), hidden),
        "bh": uni(k4, (hidden, 1), hidden),
        "wl": uni(k5, (hidden, 1), hidden),
        "bl": uni(k6, (1, 1), hidden),
    }


def net_reference(x, params):
    """Pure-JAX reference (conventional batch-major layout) for verification."""
    h = jax.nn.sigmoid(x @ params["w1"].T + params["b1"].T)
    for _ in range(NUM_HIDDEN_LAYERS):
        h = jax.nn.sigmoid(h @ params["wh"].T + params["bh"].T)
    out = jax.nn.sigmoid(h @ params["wl"] + params["bl"])
    return out * 5.0


if __name__ == "__main__":
    batch, num_input, hidden = 8, 16, 32

    key = jax.random.PRNGKey(0)
    kx, kp = jax.random.split(key)
    x = jax.random.normal(kx, (batch, num_input), jnp.float32)
    params = init_params(kp, num_input, hidden)

    out = jax.block_until_ready(net_forward(x, params))
    ref = net_reference(x, params)

    assert out.shape == (batch, 1), out.shape
    assert jnp.allclose(out, ref, atol=1e-4, rtol=1e-4), (
        f"mismatch: max abs err {jnp.max(jnp.abs(out - ref))}"
    )
    print("KERNEL_OK")
</pallas_src>

<mosaic_0001>
module attributes {stable_mosaic.version = 11 : i64} {
  func.func @net_kernel(%arg0: i32, %arg1: memref<8x16xf32, #tpu.memory_space<vmem>>, %arg2: memref<32x16xf32, #tpu.memory_space<vmem>>, %arg3: memref<32x1xf32, #tpu.memory_space<vmem>>, %arg4: memref<32x32xf32, #tpu.memory_space<vmem>>, %arg5: memref<32x1xf32, #tpu.memory_space<vmem>>, %arg6: memref<32x1xf32, #tpu.memory_space<vmem>>, %arg7: memref<1x1xf32, #tpu.memory_space<vmem>>, %arg8: memref<1x8xf32, #tpu.memory_space<vmem>>) attributes {dimension_semantics = [#tpu.dimension_semantics<parallel>], iteration_bounds = array<i64: 1>, scalar_prefetch = 0 : i64, scratch_operands = 0 : i64, tpu.core_type = #tpu.core_type<tc>, window_params = [{transform_indices = @transform_0, window_bounds = array<i64: 8, 16>}, {pipeline_mode = #tpu.pipeline_mode<synchronous>, transform_indices = @transform_1, window_bounds = array<i64: 32, 16>}, {pipeline_mode = #tpu.pipeline_mode<synchronous>, transform_indices = @transform_2, window_bounds = array<i64: 32, 1>}, {pipeline_mode = #tpu.pipeline_mode<synchronous>, transform_indices = @transform_3, window_bounds = array<i64: 32, 32>}, {pipeline_mode = #tpu.pipeline_mode<synchronous>, transform_indices = @transform_4, window_bounds = array<i64: 32, 1>}, {pipeline_mode = #tpu.pipeline_mode<synchronous>, transform_indices = @transform_5, window_bounds = array<i64: 32, 1>}, {pipeline_mode = #tpu.pipeline_mode<synchronous>, transform_indices = @transform_6, window_bounds = array<i64: 1, 1>}, {transform_indices = @transform_7, window_bounds = array<i64: 1, 8>}]} {
    %c0 = arith.constant 0 : index
    %c0_0 = arith.constant 0 : index
    %0 = vector.load %arg2[%c0, %c0_0] : memref<32x16xf32, #tpu.memory_space<vmem>>, vector<32x16xf32>
    %c0_1 = arith.constant 0 : index
    %c0_2 = arith.constant 0 : index
    %1 = vector.load %arg1[%c0_1, %c0_2] : memref<8x16xf32, #tpu.memory_space<vmem>>, vector<8x16xf32>
    "tpu.trace_start"() <{level = 10 : i32, message = "hi,bi->hb"}> : () -> ()
    %cst = arith.constant dense<0.000000e+00> : vector<32x8xf32>
    %2 = tpu.matmul %0, %1, %cst {dimension_numbers = #tpu.dot_dimension_numbers<[1], [1], [0], [0], [0, 0, 1, 0], [], []>} : vector<32x16xf32>, vector<8x16xf32>, vector<32x8xf32> -> vector<32x8xf32>
    "tpu.trace_stop"() : () -> ()
    %c0_3 = arith.constant 0 : index
    %c0_4 = arith.constant 0 : index
    %3 = vector.load %arg3[%c0_3, %c0_4] : memref<32x1xf32, #tpu.memory_space<vmem>>, vector<32x1xf32>
    %4 = vector.broadcast %3 : vector<32x1xf32> to vector<32x8xf32>
    %5 = arith.addf %2, %4 : vector<32x8xf32>
    %cst_5 = arith.constant 5.000000e-01 : f32
    %6 = vector.broadcast %cst_5 : f32 to vector<32x8xf32>
    %7 = arith.mulf %6, %5 : vector<32x8xf32>
    %8 = math.tanh %7 : vector<32x8xf32>
    %cst_6 = arith.constant 5.000000e-01 : f32
    %9 = vector.broadcast %cst_6 : f32 to vector<32x8xf32>
    %10 = arith.mulf %9, %8 : vector<32x8xf32>
    %cst_7 = arith.constant 5.000000e-01 : f32
    %11 = vector.broadcast %cst_7 : f32 to vector<32x8xf32>
    %12 = arith.addf %10, %11 : vector<32x8xf32>
    %c0_8 = arith.constant 0 : index
    %c0_9 = arith.constant 0 : index
    %13 = vector.load %arg4[%c0_8, %c0_9] : memref<32x32xf32, #tpu.memory_space<vmem>>, vector<32x32xf32>
    %c0_10 = arith.constant 0 : index
    %c0_11 = arith.constant 0 : index
    %14 = vector.load %arg5[%c0_10, %c0_11] : memref<32x1xf32, #tpu.memory_space<vmem>>, vector<32x1xf32>
    %cst_12 = arith.constant dense<0.000000e+00> : vector<32x8xf32>
    %15 = tpu.matmul %13, %12, %cst_12 {dimension_numbers = #tpu.dot_dimension_numbers<[1], [0], [0], [1], [0, 0, 1, 1], [], []>} : vector<32x32xf32>, vector<32x8xf32>, vector<32x8xf32> -> vector<32x8xf32>
    %16 = vector.broadcast %14 : vector<32x1xf32> to vector<32x8xf32>
    %17 = arith.addf %15, %16 : vector<32x8xf32>
    %cst_13 = arith.constant 5.000000e-01 : f32
    %18 = vector.broadcast %cst_13 : f32 to vector<32x8xf32>
    %19 = arith.mulf %18, %17 : vector<32x8xf32>
    %20 = math.tanh %19 : vector<32x8xf32>
    %cst_14 = arith.constant 5.000000e-01 : f32
    %21 = vector.broadcast %cst_14 : f32 to vector<32x8xf32>
    %22 = arith.mulf %21, %20 : vector<32x8xf32>
    %cst_15 = arith.constant 5.000000e-01 : f32
    %23 = vector.broadcast %cst_15 : f32 to vector<32x8xf32>
    %24 = arith.addf %22, %23 : vector<32x8xf32>
    %cst_16 = arith.constant dense<0.000000e+00> : vector<32x8xf32>
    %25 = tpu.matmul %13, %24, %cst_16 {dimension_numbers = #tpu.dot_dimension_numbers<[1], [0], [0], [1], [0, 0, 1, 1], [], []>} : vector<32x32xf32>, vector<32x8xf32>, vector<32x8xf32> -> vector<32x8xf32>
    %26 = vector.broadcast %14 : vector<32x1xf32> to vector<32x8xf32>
    %27 = arith.addf %25, %26 : vector<32x8xf32>
    %cst_17 = arith.constant 5.000000e-01 : f32
    %28 = vector.broadcast %cst_17 : f32 to vector<32x8xf32>
    %29 = arith.mulf %28, %27 : vector<32x8xf32>
    %30 = math.tanh %29 : vector<32x8xf32>
    %cst_18 = arith.constant 5.000000e-01 : f32
    %31 = vector.broadcast %cst_18 : f32 to vector<32x8xf32>
    %32 = arith.mulf %31, %30 : vector<32x8xf32>
    %cst_19 = arith.constant 5.000000e-01 : f32
    %33 = vector.broadcast %cst_19 : f32 to vector<32x8xf32>
    %34 = arith.addf %32, %33 : vector<32x8xf32>
    %c0_20 = arith.constant 0 : index
    %c0_21 = arith.constant 0 : index
    %35 = vector.load %arg6[%c0_20, %c0_21] : memref<32x1xf32, #tpu.memory_space<vmem>>, vector<32x1xf32>
    %36 = vector.broadcast %35 : vector<32x1xf32> to vector<32x8xf32>
    %37 = arith.mulf %34, %36 : vector<32x8xf32>
    %cst_22 = arith.constant dense<0.000000e+00> : vector<8xf32>
    %38 = vector.multi_reduction <add>, %37, %cst_22 [0] : vector<32x8xf32> to vector<8xf32>
    %39 = vector.shape_cast %38 : vector<8xf32> to vector<1x8xf32>
    %c0_23 = arith.constant 0 : index
    %c0_24 = arith.constant 0 : index
    %40 = vector.load %arg7[%c0_23, %c0_24] : memref<1x1xf32, #tpu.memory_space<vmem>>, vector<1x1xf32>
    %41 = vector.broadcast %40 : vector<1x1xf32> to vector<1x8xf32>
    %42 = arith.addf %39, %41 : vector<1x8xf32>
    %cst_25 = arith.constant 5.000000e-01 : f32
    %43 = vector.broadcast %cst_25 : f32 to vector<1x8xf32>
    %44 = arith.mulf %43, %42 : vector<1x8xf32>
    %45 = math.tanh %44 : vector<1x8xf32>
    %cst_26 = arith.constant 5.000000e-01 : f32
    %46 = vector.broadcast %cst_26 : f32 to vector<1x8xf32>
    %47 = arith.mulf %46, %45 : vector<1x8xf32>
    %cst_27 = arith.constant 5.000000e-01 : f32
    %48 = vector.broadcast %cst_27 : f32 to vector<1x8xf32>
    %49 = arith.addf %47, %48 : vector<1x8xf32>
    %cst_28 = arith.constant 5.000000e+00 : f32
    %50 = vector.broadcast %cst_28 : f32 to vector<1x8xf32>
    %51 = arith.mulf %49, %50 : vector<1x8xf32>
    %c0_29 = arith.constant 0 : index
    %c0_30 = arith.constant 0 : index
    %52 = vector.load %arg8[%c0_29, %c0_30] : memref<1x8xf32, #tpu.memory_space<vmem>>, vector<1x8xf32>
    tpu.vector_store %arg8[%c0_29, %c0_30], %51 {strides = array<i32>} : memref<1x8xf32, #tpu.memory_space<vmem>>, vector<1x8xf32>,
    return
  }
  func.func @transform_0(%arg0: i32) -> (i32, i32) {
    %c0_i32 = arith.constant 0 : i32
    %c0_i32_0 = arith.constant 0 : i32
    return %arg0, %c0_i32 : i32, i32
  }
  func.func @transform_1(%arg0: i32) -> (i32, i32) {
    %c0_i32 = arith.constant 0 : i32
    %c0_i32_0 = arith.constant 0 : i32
    %c0_i32_1 = arith.constant 0 : i32
    return %c0_i32, %c0_i32_0 : i32, i32
  }
  func.func @transform_2(%arg0: i32) -> (i32, i32) {
    %c0_i32 = arith.constant 0 : i32
    %c0_i32_0 = arith.constant 0 : i32
    %c0_i32_1 = arith.constant 0 : i32
    return %c0_i32, %c0_i32_0 : i32, i32
  }
  func.func @transform_3(%arg0: i32) -> (i32, i32) {
    %c0_i32 = arith.constant 0 : i32
    %c0_i32_0 = arith.constant 0 : i32
    %c0_i32_1 = arith.constant 0 : i32
    return %c0_i32, %c0_i32_0 : i32, i32
  }
  func.func @transform_4(%arg0: i32) -> (i32, i32) {
    %c0_i32 = arith.constant 0 : i32
    %c0_i32_0 = arith.constant 0 : i32
    %c0_i32_1 = arith.constant 0 : i32
    return %c0_i32, %c0_i32_0 : i32, i32
  }
  func.func @transform_5(%arg0: i32) -> (i32, i32) {
    %c0_i32 = arith.constant 0 : i32
    %c0_i32_0 = arith.constant 0 : i32
    %c0_i32_1 = arith.constant 0 : i32
    return %c0_i32, %c0_i32_0 : i32, i32
  }
  func.func @transform_6(%arg0: i32) -> (i32, i32) {
    %c0_i32 = arith.constant 0 : i32
    %c0_i32_0 = arith.constant 0 : i32
    %c0_i32_1 = arith.constant 0 : i32
    return %c0_i32, %c0_i32_0 : i32, i32
  }
  func.func @transform_7(%arg0: i32) -> (i32, i32) {
    %c0_i32 = arith.constant 0 : i32
    %c0_i32_0 = arith.constant 0 : i32
    return %c0_i32, %arg0 : i32, i32
  }
}

</mosaic_0001>

<bundles_post_ra>
// kernel: tpu_custom_call.1
= control target key start
LH: loop header
LB: loop body
LE: loop exit
PB: predicated region body
PF: predicated region fallthrough
CT: control target
= control target key end

     0   :  { %s770_s0 = inlined_call_operand.vmem [shape: f32[8,16], index: 0, kind: input, shape index: {}]   ;;  %s771_s1 = inlined_call_operand.vmem [shape: f32[32,16], index: 1, kind: input, shape index: {}]   ;;  %s772_s2 = inlined_call_operand.vmem [shape: f32[32,1], index: 2, kind: input, shape index: {}]   ;;  %s773_s3 = inlined_call_operand.vmem [shape: f32[32,32], index: 3, kind: input, shape index: {}]   ;;  %s774_s4 = inlined_call_operand.vmem [shape: f32[32,1], index: 4, kind: input, shape index: {}]   ;;  %s775_s5 = inlined_call_operand.vmem [shape: f32[32,1], index: 5, kind: input, shape index: {}]   ;;  %s776_s6 = inlined_call_operand.<no memory space> [shape: f32[1,1], index: 6, kind: input, shape index: {}]   ;;  %s777_s7 = inlined_call_operand.hbm [shape: f32[1,8], index: 7, kind: output, shape index: {}]  }
   0x1   :  { %v12_v0 = vstv %s776_s6 }
   0x2   :  { %13 = vst [vmem:[#allocation2] sm:$0x1] %v12_v0 }
   0x3   :  { %v33_v1 = vld [vmem:[%s770_s0] sm:$0xff]  ;;  %vm58_vm0 = vcmask 130048   ;;  %v30_v4 = vld [vmem:[%s771_s1 + $0x8] sm:$0xff]  ;;  %v632_v5 = vmov 0   ;;  %v36_v6 = vld [vmem:[%s772_s2 + $0x10] sm:$0xff] }
   0x4   :  { %v29_v2 = vld [vmem:[%s771_s1] sm:$0xff]  ;;  %526 = vmatprep.subr.msk.mxu0 %vm58_vm0, %v33_v1  ;;  %580 = vset.pattern.permute.xlu0 %v632_v5  ;;  %v31_v7 = vld [vmem:[%s771_s1 + $0x10] sm:$0xff]  ;;  %v35_v8 = vld [vmem:[%s772_s2 + $0x8] sm:$0xff] }
   0x5   :  { %528 = vmatprep.mubr.msk.f32.mxu0 %vm58_vm0, %v29_v2  ;;  %v34_v3 = vld [vmem:[%s772_s2] sm:$0xff]  ;;  %527 = vmatpush3.xpose.msk.msra.mxu0 %vm58_vm0, %v33_v1  ;;  %v37_v9 = vld [vmem:[%s772_s2 + $0x18] sm:$0xff] }
   0x6   :  { %40 = vperm.xlu0 %580, %v34_v3   ;;  %581 = vset.pattern.permute.xlu1 %v632_v5  ;;  %v32_v10 = vld [vmem:[%s771_s1 + $0x18] sm:$0xff] }
   0x7   :  { %50 = vperm.xlu1 %581, %v36_v6  }
   0x8   :  { %529 = vmatmul.mubr.msk.f32.vlgmr.msra.gmra.mrb[0].mxu0 %vm58_vm0, %v30_v4 }
   0x9   :  { %531 = vmatprep.mubr.msk.f32.mxu0 %vm58_vm0, %v31_v7 }
   0xa   :  { %14 = vsyncpa [#allocation4], 0  ;;  %45 = vperm.xlu0 %580, %v35_v8   ;;  %v179_v11 = vld [vmem:[%s774_s4] sm:$0xff]  ;;  %v180_v12 = vld [vmem:[%s774_s4 + $0x8] sm:$0xff]  ;;  %vm203_vm1 = vcmask 261120   ;;  %vm446_vm2 = vcmask 64512  }
   0xb   :  { %55 = vperm.xlu1 %581, %v37_v9   ;;  %v181_v13 = vld [vmem:[%s774_s4 + $0x10] sm:$0xff]  ;;  %v182_v14 = vld [vmem:[%s774_s4 + $0x18] sm:$0xff]  ;;  %v418_v15 = vld [vmem:[%s775_s5] sm:$0xff]  ;;  %vm476_vm3 = vcmask 57344  }
   0xc   :  { %532 = vmatmul.mubr.msk.f32.gmra.mrb[2].mxu0 %vm58_vm0, %v32_v10  ;;  %v419_v16 = vld [vmem:[%s775_s5 + $0x8] sm:$0xff]  ;;  %v420_v17 = vld [vmem:[%s775_s5 + $0x10] sm:$0xff]  ;;  %v421_v18 = vld [vmem:[%s775_s5 + $0x18] sm:$0xff] }
   0xd   :  { %v460_v19 = vld [vmem:[#allocation2] sm:$0x1]  ;;  %v176_v51 = vld [vmem:[%s773_s3 + $0x8] sm:$0xff]  ;;  %v177_v52 = vld [vmem:[%s773_s3 + $0x10] sm:$0xff] }
   0xe   :  { %185 = vperm.xlu0 %580, %v179_v11   ;;  %v175_v20 = vld [vmem:[%s773_s3] sm:$0xff]  ;;  %v178_v53 = vld [vmem:[%s773_s3 + $0x18] sm:$0xff]  ;;  %s633_s3 = smov [#allocation3]  }
   0xf   :  { %190 = vperm.xlu1 %581, %v180_v12   ;;  %542 = vmatprep.mubr.msk.f32.mxu1 %vm203_vm1, %v175_v20  ;;  %s484_s14 = sshll.u32 %s633_s3, 4  ;;  %s485_s14 = int_to_ptr.vmem [resolvable:$true] %s484_s14 }
  0x10   :  { %556 = vmatprep.mubr.msk.f32.mxu0 %vm203_vm1, %v175_v20  ;;  %s608_s15 = scalar_lea.vmem %s485_s14, 16  ;;  %s612_s16 = scalar_lea.vmem %s485_s14, 32 }
  0x11   :  { %p609_p0 = scmp.ne.s32.totalorder %s485_s14, %s608_s15  ;;  %p613_p1 = scmp.lt.s32.totalorder %s485_s14, %s485_s14 }
  0x12   :  { %195 = vperm.xlu0 %580, %v181_v13   ;;  %p614_p2 = scmp.lt.s32.totalorder %s612_s16, %s608_s15 }
  0x13   :  { %200 = vperm.xlu1 %581, %v182_v14  }
  0x14   :  { %p615_p3 = por %p614_p2, %p613_p1 }
  0x16   :  { %424 = vperm.xlu0 %580, %v418_v15   ;;  %p616_p4 = pnand %p615_p3, %p609_p0 }
  0x17   :  { %429 = vperm.xlu1 %581, %v419_v16  }
  0x1a   :  { %434 = vperm.xlu0 %580, %v420_v17  }
  0x1b   :  { %439 = vperm.xlu1 %581, %v421_v18  }
  0x1e   :  { %463 = vperm.xlu0 %580, %v460_v19  }
  0x85   :  { %v41_v21 = vpop.permute.xlu0 %40 }
  0x86   :  { %v51_v22 = vpop.permute.xlu1 %50 }
  0x89   :  { %v46_v23 = vpop.permute.xlu0 %45 }
  0x8a   :  { %v56_v29 = vpop.permute.xlu1 %55 }
  0x8d   :  { %v186_v55 = vpop.permute.xlu0 %185 }
  0x8e   :  { %v191_v54 = vpop.permute.xlu1 %190 }
  0x91   :  { %v196_v0 = vpop.permute.xlu0 %195 }
  0x92   :  { %v201_v61 = vpop.permute.xlu1 %200 }
  0xdb   :  { %v530_v24 = vpop.f32.mrb[0].mxu0 }
  0xdc   :  { %v146_v25 = vadd.f32 %v530_v24, %v46_v23  ;;  %v140_v26 = vpop.f32.mrb[1].mxu0 }
  0xdd   :  { %v141_v27 = vadd.f32 %v140_v26, %v41_v21 }
  0xde   :  { %v160_v28 = vmul.f32 0.5, %v146_v25 }
  0xdf   :  { %v159_v30 = vmul.f32 0.5, %v141_v27  ;;  %v533_v31 = vpop.f32.mrb[2].mxu0 }
  0xe0   :  { %582 = vtanh.f32 %v160_v28  ;;  %v156_v32 = vadd.f32 %v533_v31, %v56_v29  ;;  %v150_v33 = vpop.f32.mrb[3].mxu0 }
  0xe1   :  { %584 = vtanh.f32 %v159_v30  ;;  %v151_v34 = vadd.f32 %v150_v33, %v51_v22 }
  0xe2   :  { %v162_v35 = vmul.f32 0.5, %v156_v32 }
  0xe3   :  { %v161_v36 = vmul.f32 0.5, %v151_v34 }
  0xe4   :  { %586 = vtanh.f32 %v162_v35 }
  0xe5   :  { %588 = vtanh.f32 %v161_v36  ;;  %v425_v36 = vpop.permute.xlu0 %424 }
  0xea   :  { %v583_v37 = vpop.eup %582 }
  0xeb   :  { %v585_v38 = vpop.eup %584  ;;  %v168_v39 = vmul.f32 0.5, %v583_v37  ;;  %v430_v37 = vpop.permute.xlu1 %429 }
  0xec   :  { %v167_v40 = vmul.f32 0.5, %v585_v38 }
  0xed   :  { %v172_v41 = vadd.f32 0.5, %v168_v39 }
  0xee   :  { %v587_v42 = vpop.eup %586  ;;  %v171_v43 = vadd.f32 0.5, %v167_v40 }
  0xef   :  { %v589_v44 = vpop.eup %588  ;;  %v170_v45 = vmul.f32 0.5, %v587_v42 }
  0xf0   :  { %v169_v46 = vmul.f32 0.5, %v589_v44  ;;  %v562_v47 = vpack.c.bf16 %v172_v41, %v171_v43 }
  0xf1   :  { %v174_v48 = vadd.f32 0.5, %v170_v45 }
  0xf2   :  { %v173_v49 = vadd.f32 0.5, %v169_v46  ;;  %563 = vmatprep.subr.bf16.mxu1 %v562_v47 }
  0xf3   :  { %565 = vmatpush3.bf16.msra.mxu1 %v562_v47 }
  0xf4   :  { %v566_v50 = vpack.c.bf16 %v174_v48, %v173_v49 }
  0xf6   :  { %567 = vmatprep.subr.bf16.mxu1 %v566_v50 }
  0xf7   :  { %569 = vmatpush3.bf16.msra.mxu1 %v566_v50  ;;  %v435_v50 = vpop.permute.xlu0 %434 }
  0xfa   :  { %543 = vmatmul.mubr.msk.f32.vlgmr.msra.gmra.mrb[0].mxu1 %vm203_vm1, %v176_v51 }
  0xfb   :  { %545 = vmatprep.mubr.msk.f32.mxu1 %vm203_vm1, %v177_v52 }
  0xfe   :  { %546 = vmatmul.mubr.msk.f32.gmra.mrb[2].mxu1 %vm203_vm1, %v178_v53 }
 0x1cd   :  { %v544_v56 = vpop.f32.mrb[0].mxu1 }
 0x1ce   :  { %v288_v57 = vadd.f32 %v544_v56, %v191_v54  ;;  %v282_v58 = vpop.f32.mrb[1].mxu1 }
 0x1cf   :  { %v283_v59 = vadd.f32 %v282_v58, %v186_v55  ;;  %v466_v58 = vlaneseq }
 0x1d0   :  { %v302_v60 = vmul.f32 0.5, %v288_v57 }
 0x1d1   :  { %v301_v62 = vmul.f32 0.5, %v283_v59  ;;  %v547_v63 = vpop.f32.mrb[2].mxu1 }
 0x1d2   :  { %590 = vtanh.f32 %v302_v60  ;;  %v298_v1 = vadd.f32 %v547_v63, %v201_v61  ;;  %v292_v2 = vpop.f32.mrb[3].mxu1 }
 0x1d3   :  { %592 = vtanh.f32 %v301_v62  ;;  %v293_v3 = vadd.f32 %v292_v2, %v196_v0  ;;  %v464_v2 = vpop.permute.xlu0 %463 }
 0x1d4   :  { %v304_v4 = vmul.f32 0.5, %v298_v1 }
 0x1d5   :  { %v303_v5 = vmul.f32 0.5, %v293_v3 }
 0x1d6   :  { %594 = vtanh.f32 %v304_v4 }
 0x1d7   :  { %596 = vtanh.f32 %v303_v5 }
 0x1dc   :  { %v591_v6 = vpop.eup %590 }
 0x1dd   :  { %v593_v7 = vpop.eup %592  ;;  %v310_v8 = vmul.f32 0.5, %v591_v6 }
 0x1de   :  { %v309_v9 = vmul.f32 0.5, %v593_v7 }
 0x1df   :  { %v314_v10 = vadd.f32 0.5, %v310_v8 }
 0x1e0   :  { %v595_v11 = vpop.eup %594  ;;  %v313_v12 = vadd.f32 0.5, %v309_v9 }
 0x1e1   :  { %v597_v13 = vpop.eup %596  ;;  %v312_v14 = vmul.f32 0.5, %v595_v11 }
 0x1e2   :  { %v311_v15 = vmul.f32 0.5, %v597_v13  ;;  %v570_v16 = vpack.c.bf16 %v314_v10, %v313_v12 }
 0x1e3   :  { %v316_v17 = vadd.f32 0.5, %v312_v14 }
 0x1e4   :  { %v315_v18 = vadd.f32 0.5, %v311_v15  ;;  %571 = vmatprep.subr.bf16.mxu0 %v570_v16 }
 0x1e5   :  { %573 = vmatpush3.bf16.msra.mxu0 %v570_v16 }
 0x1e6   :  { %v574_v19 = vpack.c.bf16 %v316_v17, %v315_v18 }
 0x1e8   :  { %575 = vmatprep.subr.bf16.mxu0 %v574_v19 }
 0x1e9   :  { %577 = vmatpush3.bf16.msra.mxu0 %v574_v19 }
 0x1ec   :  { %557 = vmatmul.mubr.msk.f32.vlgmr.msra.gmra.mrb[4].mxu0 %vm203_vm1, %v176_v51  ;;  %v440_v51 = vpop.permute.xlu1 %439 }
 0x1ed   :  { %559 = vmatprep.mubr.msk.f32.mxu0 %vm203_vm1, %v177_v52 }
 0x1f0   :  { %560 = vmatmul.mubr.msk.f32.gmra.mrb[6].mxu0 %vm203_vm1, %v178_v53 }
 0x2bf   :  { %v558_v20 = vpop.f32.mrb[4].mxu0 }
 0x2c0   :  { %v389_v21 = vadd.f32 %v558_v20, %v191_v54  ;;  %v383_v22 = vpop.f32.mrb[5].mxu0 }
 0x2c1   :  { %v384_v23 = vadd.f32 %v383_v22, %v186_v55 }
 0x2c2   :  { %v403_v24 = vmul.f32 0.5, %v389_v21 }
 0x2c3   :  { %v402_v25 = vmul.f32 0.5, %v384_v23  ;;  %v561_v26 = vpop.f32.mrb[6].mxu0 }
 0x2c4   :  { %598 = vtanh.f32 %v403_v24  ;;  %v399_v27 = vadd.f32 %v561_v26, %v201_v61  ;;  %v393_v28 = vpop.f32.mrb[7].mxu0  ;;  %v467_v61 = vshrl.u32 %v466_v58, 7 }
 0x2c5   :  { %600 = vtanh.f32 %v402_v25  ;;  %v394_v29 = vadd.f32 %v393_v28, %v196_v0 }
 0x2c6   :  { %v405_v30 = vmul.f32 0.5, %v399_v27  ;;  %v468_v0 = vsub.s32 0, %v467_v61 }
 0x2c7   :  { %v404_v31 = vmul.f32 0.5, %v394_v29 }
 0x2c8   :  { %602 = vtanh.f32 %v405_v30  ;;  %v469_v4 = vrot.slane %v464_v2, %v468_v0 }
 0x2c9   :  { %604 = vtanh.f32 %v404_v31 }
 0x2ce   :  { %v599_v32 = vpop.eup %598 }
 0x2cf   :  { %v601_v33 = vpop.eup %600  ;;  %v411_v34 = vmul.f32 0.5, %v599_v32 }
 0x2d0   :  { %v410_v35 = vmul.f32 0.5, %v601_v33 }
 0x2d1   :  { %v415_v38 = vadd.f32 0.5, %v411_v34 }
 0x2d2   :  { %v603_v39 = vpop.eup %602  ;;  %v414_v40 = vadd.f32 0.5, %v410_v35 }
 0x2d3   :  { %v605_v41 = vpop.eup %604  ;;  %v443_v42 = vmul.f32 %v430_v37, %v415_v38  ;;  %v413_v43 = vmul.f32 0.5, %v603_v39 }
 0x2d4   :  { %v442_v44 = vmul.f32 %v425_v36, %v414_v40  ;;  %v412_v45 = vmul.f32 0.5, %v605_v41 }
 0x2d5   :  { %v448_v46 = vsel %vm446_vm2, %v443_v42, 0.0  ;;  %v417_v47 = vadd.f32 0.5, %v413_v43 }
 0x2d6   :  { %v447_v48 = vsel %vm446_vm2, %v442_v44, 0.0  ;;  %v416_v49 = vadd.f32 0.5, %v412_v45 }
 0x2d7   :  { %v449_v52 = vadd.f32 %v448_v46, %v447_v48  ;;  %v445_v53 = vmul.f32 %v440_v51, %v417_v47 }
 0x2d8   :  { %v444_v54 = vmul.f32 %v435_v50, %v416_v49 }
 0x2d9   :  { %v452_v57 = vsel %vm446_vm2, %v445_v53, 0.0 }
 0x2da   :  { %v450_v55 = vsel %vm446_vm2, %v444_v54, 0.0 }
 0x2db   :  { %v451_v56 = vadd.f32 %v450_v55, %v449_v52 }
 0x2dd   :  { %v453_v59 = vadd.f32 %v452_v57, %v451_v56 }
 0x2df   :  { %v454_v60 = vrot.slane %v453_v59, 4 }
 0x2e1   :  { %v455_v62 = vadd.f32 %v454_v60, %v453_v59 }
 0x2e3   :  { %v456_v63 = vrot.slane %v455_v62, 2 }
 0x2e5   :  { %v457_v1 = vadd.f32 %v456_v63, %v455_v62 }
 0x2e7   :  { %v458_v3 = vrot.slane %v457_v1, 1 }
 0x2e9   :  { %v459_v5 = vadd.f32 %v458_v3, %v457_v1 }
 0x2eb   :  { %v470_v6 = vadd.f32 %v469_v4, %v459_v5 }
 0x2ed   :  { %v471_v7 = vmul.f32 0.5, %v470_v6 }
 0x2ef   :  { %606 = vtanh.f32 %v471_v7 }
 0x2f9   :  { %v607_v8 = vpop.eup %606 }
 0x2fa   :  { %v473_v9 = vmul.f32 0.5, %v607_v8 }
 0x2fc   :  { %v474_v10 = vadd.f32 0.5, %v473_v9 }
 0x2fe   :  { %v475_v11 = vmul.f32 5.0, %v474_v10 }
 0x300   :  { %477 = vst.msk [vmem:[#allocation3] sm:$0x1] %vm476_vm3, %v475_v11 }
 0x301   :  { %619 = shalt.err (!%p616_p4)
}
 0x302   :  { %s620_s19 = scalar_lea.hbm %s777_s7, 16 }
 0x303   :  { %p621_p5 = scmp.ne.s32.totalorder %s777_s7, %s620_s19  ;;  %p624_p6 = scmp.lt.u32.totalorder %s620_s19, %s777_s7 }
 0x305   :  { %p626_p7 = pnand %p624_p6, %p621_p5 }
 0x307   :  { %629 = shalt.err (!%p626_p7)
}
 0x308   :  { %487 = dma.vmem_to_hbm [thread:$0]  %s485_s14, 16, %s777_s7, [#allocation4]  }
 0x309   :  { %630 = dma.done.wait [#allocation4], 16  }
 0x30a   :  { %631 = vsyncadd [#allocation4], 4294967280 }
 0x30b   :  { %491 = vsyncpa [#allocation4], 1 }

</bundles_post_ra>
